<compile_context>
chip_gen: v5e
topology: v5e:2x2
jax: 0.10.0
libtpu: 0.0.40
codegen_flags: <defaults>
</compile_context>

<pallas_src>
import functools

import jax
import jax.numpy as jnp
from jax import lax
from jax.experimental import pallas as pl
from jax.experimental.pallas import tpu as pltpu

# ----------------------------- model config (synthetic, deterministic) -------
H_ENC = 32    # encoder hidden (encoder_channels[0] surrogate)
C_GEO = 32    # geo_lossl_channels[0]
H_DEC = 32    # decoder hidden (decoder_channels[0] surrogate)

LANES = 128   # lane width of the per-tile partial-loss output

# packed weight-slab row layout, f32 (128, 128); all offsets 8-row aligned
R_W1 = 0      # rows 0:3   -> encoder layer-1 color weights (1/255 pre-folded)
              # row  3     -> 2*w_e1[3] + b_e1 (constant-2 feature + bias folded)
              # rows 4:8   -> zero
R_W2 = 8      # rows 8:40  -> w_e2
R_B2 = 40     # row  40    -> b_e2
R_W3 = 48     # rows 48:80 -> w_d1
R_B3 = 80     # row  80    -> b_d1
R_W4 = 88     # rows 88:120-> w_d2
R_B4 = 120    # row  120   -> b_d2
W_ROWS = 128

TM_MAX = 8192                   # points per grid step (HBM-bound; amortize overhead)
VMEM_LIMIT_BYTES = 48 * 1024 * 1024   # > v5e/v6e default scoped, < v7x physical

CFG = dict(
    bits_loss_factor=0.2,
    warmup_fea_loss_factor=1.0,
    warmup_fea_loss_steps=100,
    color_recon_loss_factor=1.0,
    warmup_color_loss_factor=2.0,
    warmup_color_loss_steps=100,
    coord_recon_loss_factor=1.0,
    linear_warmup=True,
)


def _round_up(x, m):
    return ((x + m - 1) // m) * m


# ----------------------------- Pallas kernel ---------------------------------
def pcc_kernel(color_ref, w_ref, fea_ref, col_ref, part_ref, *, n_valid, tm):
    i = pl.program_id(0)

    # packed input: lanes 0:3 = raw color (0..255), lane 3 = 1.0, lanes 4:8 = 0
    colf = color_ref[...]                                   # (tm, 8) f32
    col_b = colf.astype(jnp.bfloat16)

    # --- packed weight slab; all slices start on 8-row (f32 tile) boundaries --
    w1 = w_ref[R_W1:R_W1 + 8, 0:H_ENC].astype(jnp.bfloat16)      # (8, H_ENC)
    w2 = w_ref[R_W2:R_W2 + H_ENC, 0:C_GEO].astype(jnp.bfloat16)  # (H_ENC, C_GEO)
    b2 = w_ref[R_B2:R_B2 + 8, 0:C_GEO][0:1]                      # (1, C_GEO) f32
    w3 = w_ref[R_W3:R_W3 + C_GEO, 0:H_DEC].astype(jnp.bfloat16)  # (C_GEO, H_DEC)
    b3 = w_ref[R_B3:R_B3 + 8, 0:H_DEC][0:1]                      # (1, H_DEC) f32
    w4 = w_ref[R_W4:R_W4 + H_DEC, 0:3].astype(jnp.bfloat16)      # (H_DEC, 3)
    b4 = w_ref[R_B4:R_B4 + 8, 0:3][0:1]                          # (1, 3) f32

    # --- get_sparse_pc feature + Encoder surrogate ---------------------------
    # feat @ W1 == color @ (W1[:3]/255) + (2*W1[3] + b1); the 1/255 scale, the
    # constant-2 feature and the bias are folded into w1 row 3 / input lane 3,
    # so a single bf16 matmul with f32 accumulation suffices.
    h = jnp.maximum(jnp.dot(col_b, w1, preferred_element_type=jnp.float32), 0.0)
    fea = jnp.dot(h.astype(jnp.bfloat16), w2,
                  preferred_element_type=jnp.float32) + b2        # (tm, C_GEO) f32

    # --- Decoder surrogate ----------------------------------------------------
    hd = jnp.maximum(
        jnp.dot(fea.astype(jnp.bfloat16), w3,
                preferred_element_type=jnp.float32) + b3, 0.0)
    col_pred = jnp.dot(hd.astype(jnp.bfloat16), w4,
                       preferred_element_type=jnp.float32) + b4   # (tm, 3) f32

    # --- single full-width stores (no zero-fill / partial-lane writes) --------
    fea_ref[...] = fea
    col_ref[...] = col_pred

    # --- per-tile partial losses (grid axis stays fully parallel) ------------
    row = i * tm + lax.broadcasted_iota(jnp.int32, (tm, 1), 0)
    valid = (row < n_valid).astype(jnp.float32)               # mask padded tail rows

    # em_lossless_based surrogate: bits = sum log2(1 + |fea|), computed on f32 fea
    # TODO(synk): learned entropy model / quantization noise omitted.
    bits = jnp.sum(valid * jnp.log2(1.0 + jnp.abs(fea)))
    diff = col_pred - colf[:, 0:3]                            # target = F[:, :-1]*255
    mse = jnp.sum(valid * diff * diff)

    lane = lax.broadcasted_iota(jnp.int32, (1, 1, LANES), 2)
    part_ref[...] = (jnp.where(lane == 0, bits, 0.0)
                     + jnp.where(lane == 1, mse, 0.0))


# ----------------------------- wrapper ----------------------------------------
def init_params(key):
    ks = jax.random.split(key, 4)
    scale = 0.1
    w_e1 = scale * jax.random.normal(ks[0], (4, H_ENC), jnp.float32)
    b_e1 = jnp.zeros((1, H_ENC), jnp.float32)
    w_e2 = scale * jax.random.normal(ks[1], (H_ENC, C_GEO), jnp.float32)
    b_e2 = jnp.zeros((1, C_GEO), jnp.float32)
    w_d1 = scale * jax.random.normal(ks[2], (C_GEO, H_DEC), jnp.float32)
    b_d1 = jnp.zeros((1, H_DEC), jnp.float32)
    w_d2 = scale * jax.random.normal(ks[3], (H_DEC, 3), jnp.float32)
    b_d2 = jnp.zeros((1, 3), jnp.float32)
    return (w_e1, b_e1, w_e2, b_e2, w_d1, b_d1, w_d2, b_d2)


def pack_weights(params):
    """Pack all weights/biases into one (128, 128) f32 slab (single DMA stream)."""
    w_e1, b_e1, w_e2, b_e2, w_d1, b_d1, w_d2, b_d2 = params
    slab = jnp.zeros((W_ROWS, LANES), jnp.float32)
    slab = slab.at[R_W1:R_W1 + 3, 0:H_ENC].set(w_e1[:3] * (1.0 / 255.0))
    slab = slab.at[R_W1 + 3, 0:H_ENC].set(2.0 * w_e1[3] + b_e1[0])
    slab = slab.at[R_W2:R_W2 + H_ENC, 0:C_GEO].set(w_e2)
    slab = slab.at[R_B2, 0:C_GEO].set(b_e2[0])
    slab = slab.at[R_W3:R_W3 + C_GEO, 0:H_DEC].set(w_d1)
    slab = slab.at[R_B3, 0:H_DEC].set(b_d1[0])
    slab = slab.at[R_W4:R_W4 + H_DEC, 0:3].set(w_d2)
    slab = slab.at[R_B4, 0:3].set(b_d2[0])
    return slab


@jax.jit
def pcc_pallas_call(color, w_slab):
    n_points = color.shape[0]

    # >= 2 grid tiles so the "parallel" axis shards across both v7x TensorCores;
    # tile rows multiple of 8; capped at TM_MAX (vmem_limit_bytes sized for it).
    tm = min(TM_MAX, _round_up((max(n_points, 16) + 1) // 2, 8))
    num_tiles = max(2, -(-n_points // tm))
    n_pad = num_tiles * tm

    # packed input: lanes 0:3 = color, lane 3 = 1.0 (bias/const-2 folding),
    # lanes 4:8 = 0, zero tail rows.  concat+pad only (no zeros+scatter pass).
    col4 = jnp.concatenate(
        [color.astype(jnp.float32), jnp.ones((n_points, 1), jnp.float32)], axis=1)
    color_in = jnp.pad(col4, ((0, n_pad - n_points), (0, 4)))

    fea_pad, col_pad, partials = pl.pallas_call(
        functools.partial(pcc_kernel, n_valid=n_points, tm=tm),
        out_shape=(
            jax.ShapeDtypeStruct((n_pad, C_GEO), jnp.float32),
            jax.ShapeDtypeStruct((n_pad, 3), jnp.float32),
            jax.ShapeDtypeStruct((num_tiles, 1, LANES), jnp.float32),
        ),
        grid_spec=pltpu.PrefetchScalarGridSpec(
            num_scalar_prefetch=0,
            grid=(num_tiles,),
            in_specs=[
                pl.BlockSpec((tm, 8), lambda i: (i, 0)),          # packed color
                pl.BlockSpec((W_ROWS, LANES), lambda i: (0, 0)),  # weight slab
            ],
            out_specs=[
                pl.BlockSpec((tm, C_GEO), lambda i: (i, 0)),      # fea
                pl.BlockSpec((tm, 3), lambda i: (i, 0)),          # color recon
                pl.BlockSpec((1, 1, LANES), lambda i: (i, 0, 0)), # per-tile losses
            ],
        ),
        compiler_params=pltpu.CompilerParams(
            dimension_semantics=("parallel",),
            vmem_limit_bytes=VMEM_LIMIT_BYTES),
    )(color_in, w_slab)

    fea = fea_pad[:n_points]
    color_recon = col_pad[:n_points]
    bits_sum = jnp.sum(partials[:, 0, 0])
    mse_sum = jnp.sum(partials[:, 0, 1])
    return fea, color_recon, bits_sum, mse_sum


def train_forward(xyz, color, params, training_step, batch_size, cfg=CFG):
    """Mirrors PCC.train_forward loss assembly (scalar glue in plain JAX)."""
    n_points = color.shape[0]
    del xyz  # TODO(synk): coordinates only drive the sparse conv neighborhoods.

    w_slab = pack_weights(params)
    fea, color_recon, bits_sum, mse_sum = pcc_pallas_call(color, w_slab)

    fea_bits_loss = bits_sum / batch_size
    color_recon_loss = mse_sum / (n_points * 3)

    # ----- warm-up factor schedule from PCC.train_forward ---------------------
    lin_fea = (cfg["warmup_fea_loss_factor"] - cfg["bits_loss_factor"]) \
        / cfg["warmup_fea_loss_steps"]
    lin_col = (cfg["warmup_color_loss_factor"] - cfg["color_recon_loss_factor"]) \
        / cfg["warmup_color_loss_steps"]

    if training_step < cfg["warmup_fea_loss_steps"]:
        fea_loss_factor = (cfg["warmup_fea_loss_factor"] - lin_fea * training_step
                           if cfg["linear_warmup"] else cfg["warmup_fea_loss_factor"])
    else:
        fea_loss_factor = cfg["bits_loss_factor"]

    if training_step < cfg["warmup_color_loss_steps"]:
        color_loss_factor = (cfg["warmup_color_loss_factor"] - lin_col * training_step
                             if cfg["linear_warmup"] else cfg["warmup_color_loss_factor"])
    else:
        color_loss_factor = cfg["color_recon_loss_factor"]

    loss_dict = {
        "fea_bits_loss": fea_bits_loss * fea_loss_factor,
        "color_recon_loss": color_recon_loss * color_loss_factor,
        # TODO(synk): coord_*_recon_loss / coord bits omitted (generative sparse
        # upsampling has no dense Pallas equivalent).
    }
    loss_dict["loss"] = sum(loss_dict.values())
    return loss_dict, fea, color_recon


# ----------------------------- main -------------------------------------------
if __name__ == "__main__":
    key = jax.random.PRNGKey(0)
    k_xyz, k_col, k_par = jax.random.split(key, 3)

    N = 300          # points (not a multiple of 8 -> exercises tail masking)
    BATCH = 2

    # xyz: [batch_idx, x, y, z] int32 (kept for interface fidelity; unused)
    xyz = jnp.concatenate(
        [jax.random.randint(k_xyz, (N, 1), 0, BATCH, jnp.int32),
         jax.random.randint(k_xyz, (N, 3), 0, 64, jnp.int32)], axis=1)
    # color: integer-valued floats in [0, 255]
    color = jnp.round(jax.random.uniform(k_col, (N, 3), jnp.float32) * 255.0)

    params = init_params(k_par)

    loss_dict, fea, color_recon = train_forward(
        xyz, color, params, training_step=10, batch_size=BATCH)

    jax.block_until_ready(loss_dict["loss"])
    jax.block_until_ready(fea)
    jax.block_until_ready(color_recon)

    assert fea.shape == (N, C_GEO)
    assert color_recon.shape == (N, 3)
    assert bool(jnp.isfinite(loss_dict["loss"]))

    print("KERNEL_OK")
</pallas_src>

<mosaic_0001>
module attributes {stable_mosaic.version = 11 : i64} {
  func.func @pcc_kernel(%arg0: i32, %arg1: memref<152x8xf32, #tpu.memory_space<vmem>>, %arg2: memref<128x128xf32, #tpu.memory_space<vmem>>, %arg3: memref<152x32xf32, #tpu.memory_space<vmem>>, %arg4: memref<152x3xf32, #tpu.memory_space<vmem>>, %arg5: memref<1x1x128xf32, #tpu.memory_space<vmem>>) attributes {dimension_semantics = [#tpu.dimension_semantics<parallel>], iteration_bounds = array<i64: 2>, scalar_prefetch = 0 : i64, scratch_operands = 0 : i64, tpu.core_type = #tpu.core_type<tc>, window_params = [{transform_indices = @transform_0, window_bounds = array<i64: 152, 8>}, {pipeline_mode = #tpu.pipeline_mode<synchronous>, transform_indices = @transform_1, window_bounds = array<i64: 128, 128>}, {transform_indices = @transform_2, window_bounds = array<i64: 152, 32>}, {transform_indices = @transform_3, window_bounds = array<i64: 152, 3>}, {transform_indices = @transform_4, window_bounds = array<i64: 1, 1, 128>}]} {
    %c0 = arith.constant 0 : index
    %c0_0 = arith.constant 0 : index
    %0 = vector.load %arg1[%c0, %c0_0] : memref<152x8xf32, #tpu.memory_space<vmem>>, vector<152x8xf32>
    %1 = arith.truncf %0 : vector<152x8xf32> to vector<152x8xbf16>
    %c0_1 = arith.constant 0 : index
    %c0_2 = arith.constant 0 : index
    %2 = vector.load %arg2[%c0_1, %c0_2] : memref<128x128xf32, #tpu.memory_space<vmem>>, vector<8x32xf32>
    %3 = arith.truncf %2 : vector<8x32xf32> to vector<8x32xbf16>
    %c8 = arith.constant 8 : index
    %c0_3 = arith.constant 0 : index
    %4 = vector.load %arg2[%c8, %c0_3] : memref<128x128xf32, #tpu.memory_space<vmem>>, vector<32x32xf32>
    %5 = arith.truncf %4 : vector<32x32xf32> to vector<32x32xbf16>
    %c40 = arith.constant 40 : index
    %c0_4 = arith.constant 0 : index
    %6 = vector.load %arg2[%c40, %c0_4] : memref<128x128xf32, #tpu.memory_space<vmem>>, vector<8x32xf32>
    %7 = vector.extract_strided_slice %6 {offsets = [0, 0], sizes = [1, 32], strides = [1, 1]} : vector<8x32xf32> to vector<1x32xf32>
    %c48 = arith.constant 48 : index
    %c0_5 = arith.constant 0 : index
    %8 = vector.load %arg2[%c48, %c0_5] : memref<128x128xf32, #tpu.memory_space<vmem>>, vector<32x32xf32>
    %9 = arith.truncf %8 : vector<32x32xf32> to vector<32x32xbf16>
    %c80 = arith.constant 80 : index
    %c0_6 = arith.constant 0 : index
    %10 = vector.load %arg2[%c80, %c0_6] : memref<128x128xf32, #tpu.memory_space<vmem>>, vector<8x32xf32>
    %11 = vector.extract_strided_slice %10 {offsets = [0, 0], sizes = [1, 32], strides = [1, 1]} : vector<8x32xf32> to vector<1x32xf32>
    %c88 = arith.constant 88 : index
    %c0_7 = arith.constant 0 : index
    %12 = vector.load %arg2[%c88, %c0_7] : memref<128x128xf32, #tpu.memory_space<vmem>>, vector<32x3xf32>
    %13 = arith.truncf %12 : vector<32x3xf32> to vector<32x3xbf16>
    %c120 = arith.constant 120 : index
    %c0_8 = arith.constant 0 : index
    %14 = vector.load %arg2[%c120, %c0_8] : memref<128x128xf32, #tpu.memory_space<vmem>>, vector<8x3xf32>
    %15 = vector.extract_strided_slice %14 {offsets = [0, 0], sizes = [1, 3], strides = [1, 1]} : vector<8x3xf32> to vector<1x3xf32>
    %cst = arith.constant dense<0.000000e+00> : vector<152x32xf32>
    %16 = tpu.matmul %1, %3, %cst {dimension_numbers = #tpu.dot_dimension_numbers<[1], [0], [0], [1], [0, 0, 1, 1], [], []>} : vector<152x8xbf16>, vector<8x32xbf16>, vector<152x32xf32> -> vector<152x32xf32>
    %cst_9 = arith.constant 0.000000e+00 : f32
    %17 = vector.broadcast %cst_9 : f32 to vector<152x32xf32>
    %18 = arith.maximumf %16, %17 : vector<152x32xf32>
    %19 = arith.truncf %18 : vector<152x32xf32> to vector<152x32xbf16>
    %cst_10 = arith.constant dense<0.000000e+00> : vector<152x32xf32>
    %20 = tpu.matmul %19, %5, %cst_10 {dimension_numbers = #tpu.dot_dimension_numbers<[1], [0], [0], [1], [0, 0, 1, 1], [], []>} : vector<152x32xbf16>, vector<32x32xbf16>, vector<152x32xf32> -> vector<152x32xf32>
    %21 = vector.broadcast %7 : vector<1x32xf32> to vector<152x32xf32>
    %22 = arith.addf %20, %21 : vector<152x32xf32>
    %23 = arith.truncf %22 : vector<152x32xf32> to vector<152x32xbf16>
    %cst_11 = arith.constant dense<0.000000e+00> : vector<152x32xf32>
    %24 = tpu.matmul %23, %9, %cst_11 {dimension_numbers = #tpu.dot_dimension_numbers<[1], [0], [0], [1], [0, 0, 1, 1], [], []>} : vector<152x32xbf16>, vector<32x32xbf16>, vector<152x32xf32> -> vector<152x32xf32>
    %25 = vector.broadcast %11 : vector<1x32xf32> to vector<152x32xf32>
    %26 = arith.addf %24, %25 : vector<152x32xf32>
    %cst_12 = arith.constant 0.000000e+00 : f32
    %27 = vector.broadcast %cst_12 : f32 to vector<152x32xf32>
    %28 = arith.maximumf %26, %27 : vector<152x32xf32>
    %29 = arith.truncf %28 : vector<152x32xf32> to vector<152x32xbf16>
    %cst_13 = arith.constant dense<0.000000e+00> : vector<152x3xf32>
    %30 = tpu.matmul %29, %13, %cst_13 {dimension_numbers = #tpu.dot_dimension_numbers<[1], [0], [0], [1], [0, 0, 1, 1], [], []>} : vector<152x32xbf16>, vector<32x3xbf16>, vector<152x3xf32> -> vector<152x3xf32>
    %31 = vector.broadcast %15 : vector<1x3xf32> to vector<152x3xf32>
    %32 = arith.addf %30, %31 : vector<152x3xf32>
    %c0_14 = arith.constant 0 : index
    %c0_15 = arith.constant 0 : index
    %33 = vector.load %arg3[%c0_14, %c0_15] : memref<152x32xf32, #tpu.memory_space<vmem>>, vector<152x32xf32>
    tpu.vector_store %arg3[%c0_14, %c0_15], %22 {strides = array<i32>} : memref<152x32xf32, #tpu.memory_space<vmem>>, vector<152x32xf32>,
    %c0_16 = arith.constant 0 : index
    %c0_17 = arith.constant 0 : index
    %34 = vector.load %arg4[%c0_16, %c0_17] : memref<152x3xf32, #tpu.memory_space<vmem>>, vector<152x3xf32>
    tpu.vector_store %arg4[%c0_16, %c0_17], %32 {strides = array<i32>} : memref<152x3xf32, #tpu.memory_space<vmem>>, vector<152x3xf32>,
    %c152_i32 = arith.constant 152 : i32
    %35 = arith.muli %arg0, %c152_i32 : i32
    %36 = tpu.iota {dimensions = array<i32: 0>} : vector<152x1xi32>
    %37 = vector.broadcast %35 : i32 to vector<152x1xi32>
    %38 = arith.addi %37, %36 : vector<152x1xi32>
    %c300_i32 = arith.constant 300 : i32
    %39 = vector.broadcast %c300_i32 : i32 to vector<152x1xi32>
    %40 = arith.cmpi slt, %38, %39 : vector<152x1xi32>
    %41 = arith.extui %40 : vector<152x1xi1> to vector<152x1xi32>
    %42 = arith.sitofp %41 : vector<152x1xi32> to vector<152x1xf32>
    %43 = math.absf %22 : vector<152x32xf32>
    %cst_18 = arith.constant 1.000000e+00 : f32
    %44 = vector.broadcast %cst_18 : f32 to vector<152x32xf32>
    %45 = arith.addf %44, %43 : vector<152x32xf32>
    %46 = math.log %45 : vector<152x32xf32>
    %cst_19 = arith.constant 2.000000e+00 : f32
    %47 = math.log %cst_19 : f32
    %48 = vector.broadcast %47 : f32 to vector<152x32xf32>
    %49 = arith.divf %46, %48 : vector<152x32xf32>
    %50 = vector.broadcast %42 : vector<152x1xf32> to vector<152x32xf32>
    %51 = arith.mulf %50, %49 : vector<152x32xf32>
    %52 = vector.shape_cast %51 : vector<152x32xf32> to vector<1x152x32xf32>
    %cst_20 = arith.constant dense<0.000000e+00> : vector<1xf32>
    %53 = vector.multi_reduction <add>, %52, %cst_20 [1, 2] : vector<1x152x32xf32> to vector<1xf32>
    %54 = vector.shape_cast %53 : vector<1xf32> to vector<1x1x1xf32>
    %55 = vector.extract %54[0, 0, 0] : f32 from vector<1x1x1xf32>
    %56 = vector.extract_strided_slice %0 {offsets = [0, 0], sizes = [152, 3], strides = [1, 1]} : vector<152x8xf32> to vector<152x3xf32>
    %57 = arith.subf %32, %56 : vector<152x3xf32>
    %58 = vector.broadcast %42 : vector<152x1xf32> to vector<152x3xf32>
    %59 = arith.mulf %58, %57 : vector<152x3xf32>
    %60 = arith.mulf %59, %57 : vector<152x3xf32>
    %61 = vector.shape_cast %60 : vector<152x3xf32> to vector<1x152x3xf32>
    %cst_21 = arith.constant dense<0.000000e+00> : vector<1xf32>
    %62 = vector.multi_reduction <add>, %61, %cst_21 [1, 2] : vector<1x152x3xf32> to vector<1xf32>
    %63 = vector.shape_cast %62 : vector<1xf32> to vector<1x1x1xf32>
    %64 = vector.extract %63[0, 0, 0] : f32 from vector<1x1x1xf32>
    %65 = tpu.iota {dimensions = array<i32: 2>} : vector<1x1x128xi32>
    %c0_i32 = arith.constant 0 : i32
    %66 = vector.broadcast %c0_i32 : i32 to vector<1x1x128xi32>
    %67 = arith.cmpi eq, %65, %66 : vector<1x1x128xi32>
    %cst_22 = arith.constant 0.000000e+00 : f32
    %68 = vector.broadcast %55 : f32 to vector<1x1x128xf32>
    %69 = vector.broadcast %cst_22 : f32 to vector<1x1x128xf32>
    %70 = arith.select %67, %68, %69 : vector<1x1x128xi1>, vector<1x1x128xf32>
    %c1_i32 = arith.constant 1 : i32
    %71 = vector.broadcast %c1_i32 : i32 to vector<1x1x128xi32>
    %72 = arith.cmpi eq, %65, %71 : vector<1x1x128xi32>
    %cst_23 = arith.constant 0.000000e+00 : f32
    %73 = vector.broadcast %64 : f32 to vector<1x1x128xf32>
    %74 = vector.broadcast %cst_23 : f32 to vector<1x1x128xf32>
    %75 = arith.select %72, %73, %74 : vector<1x1x128xi1>, vector<1x1x128xf32>
    %76 = arith.addf %70, %75 : vector<1x1x128xf32>
    %c0_24 = arith.constant 0 : index
    %c0_25 = arith.constant 0 : index
    %c0_26 = arith.constant 0 : index
    %77 = vector.load %arg5[%c0_24, %c0_25, %c0_26] : memref<1x1x128xf32, #tpu.memory_space<vmem>>, vector<1x1x128xf32>
    tpu.vector_store %arg5[%c0_24, %c0_25, %c0_26], %76 {strides = array<i32>} : memref<1x1x128xf32, #tpu.memory_space<vmem>>, vector<1x1x128xf32>,
    return
  }
  func.func @transform_0(%arg0: i32) -> (i32, i32) {
    %c0_i32 = arith.constant 0 : i32
    %c0_i32_0 = arith.constant 0 : i32
    return %arg0, %c0_i32 : i32, i32
  }
  func.func @transform_1(%arg0: i32) -> (i32, i32) {
    %c0_i32 = arith.constant 0 : i32
    %c0_i32_0 = arith.constant 0 : i32
    %c0_i32_1 = arith.constant 0 : i32
    return %c0_i32, %c0_i32_0 : i32, i32
  }
  func.func @transform_2(%arg0: i32) -> (i32, i32) {
    %c0_i32 = arith.constant 0 : i32
    %c0_i32_0 = arith.constant 0 : i32
    return %arg0, %c0_i32 : i32, i32
  }
  func.func @transform_3(%arg0: i32) -> (i32, i32) {
    %c0_i32 = arith.constant 0 : i32
    %c0_i32_0 = arith.constant 0 : i32
    return %arg0, %c0_i32 : i32, i32
  }
  func.func @transform_4(%arg0: i32) -> (i32, i32, i32) {
    %c0_i32 = arith.constant 0 : i32
    %c0_i32_0 = arith.constant 0 : i32
    %c0_i32_1 = arith.constant 0 : i32
    return %arg0, %c0_i32, %c0_i32_0 : i32, i32, i32
  }
}

</mosaic_0001>

<bundles_post_ra>
// kernel: pcc_pallas_call.1
= control target key start
LH: loop header
LB: loop body
LE: loop exit
PB: predicated region body
PF: predicated region fallthrough
CT: control target
= control target key end

     0   :  { %s1414_s15 = smov 0   ;;  %s1922_s0 = inlined_call_operand.vmem [shape: f32[304,8], index: 0, kind: input, shape index: {}]   ;;  %s1923_s1 = inlined_call_operand.vmem [shape: f32[128,128], index: 1, kind: input, shape index: {}]   ;;  %s1924_s2 = inlined_call_operand.vmem [shape: f32[304,32], index: 2, kind: output, shape index: {0}]   ;;  %s1925_s3 = inlined_call_operand.vmem [shape: f32[304,3], index: 3, kind: output, shape index: {1}]   ;;  %s1926_s4 = inlined_call_operand.vmem [shape: f32[2,1,128], index: 4, kind: output, shape index: {2}]  }
   0x1 LB: > { %s1420_s16 = sadd.s32 4294967295, %s1385_s15   ;;  %p1241_p0 = scmp.ge.s32.totalorder %s1385_s15, 1  ;;  %s1385_s15 = sphi %s1414_s15, %s15_s15  }
   0x2   : > { %p168_p1 = scmp.lt.s32.totalorder %s1385_s15, 3 }
   0x4   : > { %p169_p2 = pnand %p1241_p0, %p168_p1 }
   0x5   : > { %s202_s19 = smul.u32 (!%p169_p2), 19, %s1420_s16  ;;  %p220_p4 = scmp.lt.s32.totalorder (!%p169_p2), %s1420_s16, 1 }
   0x6   : > { %172 = sbr.rel (%p169_p2) target bundleno = 910 (0x38e), region = 28 }
   0x7   : > { %p203_p3 = scmp.lt.s32.totalorder (!%p169_p2), %s202_s19, 37  ;;  %s744_s22 = smul.u32 (!%p169_p2), 152, %s1420_s16 }
   0xb   : > { %v253_v0 = vld [vmem:[%s1923_s1] sm:$0xff]  ;;  %vm307_vm0 = vcmask 1043456   ;;  %s1928_s19 = smov (!%p203_p3, %s202_s19), 37  ;;  %vm276_vm1 = vcmask 64512   ;;  %v257_v24 = vld [vmem:[%s1923_s1 + $0x18] sm:$0xff]  ;;  %v255_v27 = vld [vmem:[%s1923_s1 + $0x8] sm:$0xff] }
   0xc   : > { %v254_v1 = vpack.c.bf16 %v253_v0, %v253_v0  ;;  %s1428_s20 = sshll.u32 %s1928_s19, 3  ;;  %v258_v25 = vld [vmem:[%s1923_s1 + $0x20] sm:$0xff]  ;;  %v256_v28 = vld [vmem:[%s1923_s1 + $0x10] sm:$0xff]  ;;  %vm399_vm2 = vcmask 261120   ;;  %s1930_s16 = smov (!%p220_p4, %s1420_s16), 1 }
   0xd   : > { %s1434_s23 = scalar_lea.vmem %s1922_s0, %s1428_s20  ;;  %v260_v26 = vpack.c.bf16 %v258_v25, %v257_v24  ;;  %v259_v29 = vpack.c.bf16 %v256_v28, %v255_v27  ;;  %s1506_s21 = scalar_lea.vmem %s1924_s2, %s1428_s20 }
   0xe   : > { %v309_v2 = vsel %vm307_vm0, %v254_v1, 0  ;;  %v224_v3 = vld [vmem:[%s1434_s23] sm:$0xff]  ;;  %v225_v4 = vld [vmem:[%s1434_s23 + $0x8] sm:$0xff]  ;;  %v226_v6 = vld [vmem:[%s1434_s23 + $0x10] sm:$0xff]  ;;  %s1795_s12 = scalar_lea.vmem %s1925_s3, %s1428_s20  ;;  %s222_s17 = scalar_lea.vmem %s1926_s4, %s1930_s16 }
   0xf   : > { %318 = vmatpush.bf16.msra.mxu0 %v309_v2  ;;  %v243_v5 = vpack.c.bf16 %v225_v4, %v224_v3  ;;  %v227_v7 = vld [vmem:[%s1434_s23 + $0x18] sm:$0xff]  ;;  %v228_v9 = vld [vmem:[%s1434_s23 + $0x20] sm:$0xff]  ;;  %v229_v10 = vld [vmem:[%s1434_s23 + $0x28] sm:$0xff]  ;;  %436 = vmatpush.bf16.msra.mxu1 %v260_v26 }
  0x10   : > { %v244_v8 = vpack.c.bf16 %v227_v7, %v226_v6  ;;  %v245_v11 = vpack.c.bf16 %v229_v10, %v228_v9  ;;  %v230_v12 = vld [vmem:[%s1434_s23 + $0x30] sm:$0xff]  ;;  %v231_v13 = vld [vmem:[%s1434_s23 + $0x38] sm:$0xff]  ;;  %v232_v15 = vld [vmem:[%s1434_s23 + $0x40] sm:$0xff] }
  0x11   : > { %v246_v14 = vpack.c.bf16 %v231_v13, %v230_v12  ;;  %v233_v16 = vld [vmem:[%s1434_s23 + $0x48] sm:$0xff]  ;;  %v234_v18 = vld [vmem:[%s1434_s23 + $0x50] sm:$0xff]  ;;  %v235_v19 = vld [vmem:[%s1434_s23 + $0x58] sm:$0xff] }
  0x12   : > { %1245 = vmatmul.msk.bf16.vlgmr.msra.gmra.mxu0 %vm276_vm1, %v243_v5  ;;  %v247_v17 = vpack.c.bf16 %v233_v16, %v232_v15  ;;  %v248_v20 = vpack.c.bf16 %v235_v19, %v234_v18  ;;  %v236_v21 = vld [vmem:[%s1434_s23 + $0x60] sm:$0xff]  ;;  %v237_v22 = vld [vmem:[%s1434_s23 + $0x68] sm:$0xff]  ;;  %v238_v30 = vld [vmem:[%s1434_s23 + $0x70] sm:$0xff] }
  0x13   : > { %v249_v23 = vpack.c.bf16 %v237_v22, %v236_v21  ;;  %437 = vmatpush.bf16.msra.mxu1 %v259_v29  ;;  %v239_v31 = vld [vmem:[%s1434_s23 + $0x78] sm:$0xff]  ;;  %v240_v33 = vld [vmem:[%s1434_s23 + $0x80] sm:$0xff]  ;;  %v241_v34 = vld [vmem:[%s1434_s23 + $0x88] sm:$0xff]  ;;  %v1387_v21 = vmov 0.6931472  }
  0x14   : > { %v250_v32 = vpack.c.bf16 %v239_v31, %v238_v30  ;;  %v251_v35 = vpack.c.bf16 %v241_v34, %v240_v33  ;;  %v242_v41 = vld [vmem:[%s1434_s23 + $0x90] sm:$0xff]  ;;  %v264_v9 = vld [vmem:[%s1923_s1 + $0x40] sm:$0xff]  ;;  %v265_v10 = vld [vmem:[%s1923_s1 + $0x48] sm:$0xff]  ;;  %1320 = vrcp.f32 %v1387_v21 }
  0x15   : > { %v252_v42 = vpack.c.bf16 %v242_v41, %v242_v41  ;;  %v262_v13 = vld [vmem:[%s1923_s1 + $0x30] sm:$0xff]  ;;  %v261_v22 = vld [vmem:[%s1923_s1 + $0x28] sm:$0xff]  ;;  %v1517_v41 = vstv %s744_s22 }
  0x1a   : > { %v1321_v24 = vpop.eup %1320 }
  0x1b   : > { %v919_v31 = vmul.f32 0.6931472, %v1321_v24  ;;  %vm923_vm3 = vweird.f32 %v1321_v24 }
  0x1d   : > { %v920_v34 = vsub.f32 1.0, %v919_v31 }
  0x22   : > { %1246 = vmatmul.msk.bf16.gmra.mxu0 %vm276_vm1, %v244_v8 }
  0x32   : > { %1247 = vmatmul.msk.bf16.gmra.mxu0 %vm276_vm1, %v245_v11  ;;  %v267_v11 = vpack.c.bf16 %v265_v10, %v264_v9 }
  0x34   : > { %535 = vmatpush.bf16.msra.mxu2 %v267_v11 }
  0x42   : > { %1248 = vmatmul.msk.bf16.gmra.mxu0 %vm276_vm1, %v246_v14  ;;  %v263_v14 = vld [vmem:[%s1923_s1 + $0x38] sm:$0xff] }
  0x43   : > { %v266_v15 = vpack.c.bf16 %v263_v14, %v262_v13 }
  0x45   : > { %536 = vmatpush.bf16.msra.mxu2 %v266_v15 }
  0x52   : > { %1249 = vmatmul.msk.bf16.gmra.mxu0 %vm276_vm1, %v247_v17 }
  0x62   : > { %1250 = vmatmul.msk.bf16.gmra.mxu0 %vm276_vm1, %v248_v20 }
  0x72   : > { %1251 = vmatmul.msk.bf16.gmra.mxu0 %vm276_vm1, %v249_v23  ;;  %v1500_v23 = vperm.slane %v261_v22, 0 }
  0x82   : > { %1252 = vmatmul.msk.bf16.gmra.mxu0 %vm276_vm1, %v250_v32 }
  0x8f   : > { %v320_v36 = vpop.f32.mrf.mxu0 }
  0x90   : > { %v369_v38 = vmax.f32 %v320_v36, 0.0 }
  0x92   : > { %1253 = vmatmul.msk.bf16.gmra.mxu0 %vm276_vm1, %v251_v35  ;;  %v745_v35 = vlaneseq }
  0x97   : > { %v322_v37 = vpop.f32.mrf.mxu0 }
  0x98   : > { %v370_v39 = vmax.f32 %v322_v37, 0.0 }
  0x9a   : > { %v388_v40 = vpack.c.bf16 %v370_v39, %v369_v38  ;;  %v921_v38 = vmul.f32 %v1321_v24, %v920_v34 }
  0x9c   : > { %1255 = vmatmul.msk.bf16.vlgmr.msra.gmra.mxu1 %vm399_vm2, %v388_v40  ;;  %v1515_v40 = vshrl.u32 %v745_v35, 7 }
  0x9f   : > { %v325_v43 = vpop.f32.mrf.mxu0 }
  0xa0   : > { %v371_v45 = vmax.f32 %v325_v43, 0.0 }
  0xa2   : > { %1254 = vmatmul.msk.bf16.gmra.mxu0 %vm276_vm1, %v252_v42 }
  0xa7   : > { %v327_v44 = vpop.f32.mrf.mxu0 }
  0xa8   : > { %v372_v46 = vmax.f32 %v327_v44, 0.0 }
  0xaa   : > { %v389_v47 = vpack.c.bf16 %v372_v46, %v371_v45  ;;  %v747_v45 = vadd.s32 8, %v1515_v40 }
  0xac   : > { %1256 = vmatmul.msk.bf16.gmra.mxu1 %vm399_vm2, %v389_v47  ;;  %v922_v47 = vadd.f32 %v1321_v24, %v921_v38 }
  0xaf   : > { %v330_v48 = vpop.f32.mrf.mxu0 }
  0xb0   : > { %v373_v50 = vmax.f32 %v330_v48, 0.0 }
  0xb7   : > { %v332_v49 = vpop.f32.mrf.mxu0 }
  0xb8   : > { %v374_v51 = vmax.f32 %v332_v49, 0.0  ;;  %v766_v49 = vadd.s32 %v1517_v41, %v1515_v40 }
  0xba   : > { %v390_v52 = vpack.c.bf16 %v374_v51, %v373_v50  ;;  %vm785_vm4 = vcmp.lt.s32.totalorder %v766_v49, 300 }
  0xbc   : > { %1257 = vmatmul.msk.bf16.gmra.mxu1 %vm399_vm2, %v390_v52 }
  0xbf   : > { %v335_v53 = vpop.f32.mrf.mxu0 }
  0xc0   : > { %v375_v55 = vmax.f32 %v335_v53, 0.0  ;;  %v767_v53 = vadd.s32 %v1517_v41, %v747_v45 }
  0xc2   : > { %vm786_vm5 = vcmp.lt.s32.totalorder %v767_v53, 300 }
  0xc7   : > { %v337_v54 = vpop.f32.mrf.mxu0 }
  0xc8   : > { %v376_v56 = vmax.f32 %v337_v54, 0.0 }
  0xca   : > { %v391_v57 = vpack.c.bf16 %v376_v56, %v375_v55  ;;  %v1526_v55 = vsel %vm923_vm3, %v1321_v24, %v922_v47 }
  0xcc   : > { %1258 = vmatmul.msk.bf16.gmra.mxu1 %vm399_vm2, %v391_v57 }
  0xcf   : > { %v340_v58 = vpop.f32.mrf.mxu0 }
  0xd0   : > { %v377_v60 = vmax.f32 %v340_v58, 0.0 }
  0xd7   : > { %v342_v59 = vpop.f32.mrf.mxu0 }
  0xd8   : > { %v378_v61 = vmax.f32 %v342_v59, 0.0  ;;  %v748_v59 = vadd.s32 16, %v1515_v40 }
  0xda   : > { %v392_v62 = vpack.c.bf16 %v378_v61, %v377_v60  ;;  %v1388_v61 = vmov 0.0  }
  0xdc   : > { %1259 = vmatmul.msk.bf16.gmra.mxu1 %vm399_vm2, %v392_v62  ;;  %v1535_v62 = vsel %vm785_vm4, 1.0, %v1388_v61 }
  0xdf   : > { %v345_v63 = vpop.f32.mrf.mxu0 }
  0xe0   : > { %v379_v1 = vmax.f32 %v345_v63, 0.0 }
  0xe7   : > { %v347_v0 = vpop.f32.mrf.mxu0 }
  0xe8   : > { %v380_v2 = vmax.f32 %v347_v0, 0.0 }
  0xea   : > { %v393_v3 = vpack.c.bf16 %v380_v2, %v379_v1  ;;  %v1538_v1 = vsel %vm786_vm5, 1.0, %v1388_v61 }
  0xec   : > { %1260 = vmatmul.msk.bf16.gmra.mxu1 %vm399_vm2, %v393_v3 }
  0xef   : > { %v350_v4 = vpop.f32.mrf.mxu0 }
  0xf0   : > { %v381_v6 = vmax.f32 %v350_v4, 0.0  ;;  %v768_v4 = vadd.s32 %v1517_v41, %v748_v59 }
  0xf2   : > { %vm787_vm6 = vcmp.lt.s32.totalorder %v768_v4, 300 }
  0xf7   : > { %v352_v5 = vpop.f32.mrf.mxu0 }
  0xf8   : > { %v382_v7 = vmax.f32 %v352_v5, 0.0 }
  0xfa   : > { %v394_v8 = vpack.c.bf16 %v382_v7, %v381_v6 }
  0xfc   : > { %1261 = vmatmul.msk.bf16.gmra.mxu1 %vm399_vm2, %v394_v8 }
  0xff   : > { %v355_v12 = vpop.f32.mrf.mxu0 }
 0x100   : > { %v383_v17 = vmax.f32 %v355_v12, 0.0  ;;  %v749_v12 = vadd.s32 24, %v1515_v40 }
 0x107   : > { %v357_v16 = vpop.f32.mrf.mxu0 }
 0x108   : > { %v384_v18 = vmax.f32 %v357_v16, 0.0 }
 0x10a   : > { %v395_v19 = vpack.c.bf16 %v384_v18, %v383_v17  ;;  %v1552_v17 = vsel %vm787_vm6, 1.0, %v1388_v61 }
 0x10c   : > { %1262 = vmatmul.msk.bf16.gmra.mxu1 %vm399_vm2, %v395_v19  ;;  %v769_v19 = vadd.s32 %v1517_v41, %v749_v12 }
 0x10e   : > { %vm788_vm7 = vcmp.lt.s32.totalorder %v769_v19, 300 }
 0x10f   : > { %v360_v20 = vpop.f32.mrf.mxu0  ;;  %v1563_v31 = vsel %vm788_vm7, 1.0, %v1388_v61 }
 0x110   : > { %v385_v26 = vmax.f32 %v360_v20, 0.0 }
 0x117   : > { %v362_v25 = vpop.f32.mrf.mxu0 }
 0x118   : > { %v386_v27 = vmax.f32 %v362_v25, 0.0 }
 0x119   : > { %v439_v28 = vpop.f32.mrf.mxu1 }
 0x11a   : > { %v396_v29 = vpack.c.bf16 %v386_v27, %v385_v26  ;;  %v440_v30 = vadd.f32 %v439_v28, %v1500_v23  ;;  %v750_v26 = vadd.s32 32, %v1515_v40 }
 0x11c   : > { %705 = vst.msk [vmem:[%s1506_s21] sm:$0xff] %vm399_vm2, %v440_v30  ;;  %v842_v32 = vand.u32 2147483647, %v440_v30  ;;  %1263 = vmatmul.msk.bf16.gmra.mxu1 %vm399_vm2, %v396_v29 }
 0x11e   : > { %v861_v33 = vadd.f32 1.0, %v842_v32 }
 0x11f   : > { %v365_v36 = vpop.f32.mrf.mxu0 }
 0x120   : > { %1322 = vlog2.f32 %v861_v33  ;;  %v387_v44 = vmax.f32 %v365_v36, 0.0  ;;  %v770_v33 = vadd.s32 %v1517_v41, %v750_v26 }
 0x121   : > { %v441_v37 = vpop.f32.mrf.mxu1 }
 0x122   : > { %v442_v39 = vadd.f32 %v441_v37, %v1500_v23  ;;  %v397_v51 = vpack.c.bf16 %v387_v44, %v387_v44  ;;  %vm789_vm8 = vcmp.lt.s32.totalorder %v770_v33, 300 }
 0x124   : > { %706 = vst.msk [vmem:[%s1506_s21 + $0x8] sm:$0xff] %vm399_vm2, %v442_v39  ;;  %v843_v42 = vand.u32 2147483647, %v442_v39  ;;  %v488_v43 = vpack.c.bf16 %v442_v39, %v440_v30 }
 0x126   : > { %v1323_v46 = vpop.eup %1322  ;;  %v862_v48 = vadd.f32 1.0, %v843_v42  ;;  %1265 = vmatmul.msk.bf16.vlgmr.msra.gmra.mxu2 %vm399_vm2, %v488_v43  ;;  %v751_v43 = vadd.s32 40, %v1515_v40 }
 0x127   : > { %v367_v50 = vpop.f32.mrf.mxu0  ;;  %v881_v52 = vmul.f32 0.6931472, %v1323_v46 }
 0x128   : > { %1324 = vlog2.f32 %v862_v48  ;;  %v1575_v48 = vsel %vm789_vm8, 1.0, %v1388_v61  ;;  %v771_v50 = vadd.s32 %v1517_v41, %v751_v43  ;;  %vm724_vm8 = vcmask 23552  }
 0x129   : > { %v444_v54 = vpop.f32.mrf.mxu1  ;;  %v925_v58 = vmul.f32 %v1526_v55, %v881_v52 }
 0x12a   : > { %v445_v56 = vadd.f32 %v444_v54, %v1500_v23  ;;  %vm790_vm9 = vcmp.lt.s32.totalorder %v771_v50, 300 }
 0x12b   : > { %v944_v2 = vmul.f32 %v1535_v62, %v925_v58 }
 0x12c   : > { %707 = vst.msk [vmem:[%s1506_s21 + $0x10] sm:$0xff] %vm399_vm2, %v445_v56  ;;  %v844_v57 = vand.u32 2147483647, %v445_v56  ;;  %1264 = vmatmul.msk.bf16.gmra.mxu1 %vm399_vm2, %v397_v51 }
 0x12d   : > { %v963_v10 = vsel %vm399_vm2, %v944_v2, 0.0 }
 0x12e   : > { %v1325_v60 = vpop.eup %1324  ;;  %v863_v63 = vadd.f32 1.0, %v844_v57  ;;  %v752_v57 = vadd.s32 48, %v1515_v40 }
 0x12f   : > { %v883_v0 = vmul.f32 0.6931472, %v1325_v60 }
 0x130   : > { %1326 = vlog2.f32 %v863_v63 }
 0x131   : > { %v926_v3 = vmul.f32 %v1526_v55, %v883_v0  ;;  %v446_v5 = vpop.f32.mrf.mxu1  ;;  %v1586_v0 = vsel %vm790_vm9, 1.0, %v1388_v61 }
 0x132   : > { %v447_v6 = vadd.f32 %v446_v5, %v1500_v23 }
 0x133   : > { %v945_v7 = vmul.f32 %v1538_v1, %v926_v3  ;;  %v772_v3 = vadd.s32 %v1517_v41, %v752_v57 }
 0x134   : > { %708 = vst.msk [vmem:[%s1506_s21 + $0x18] sm:$0xff] %vm399_vm2, %v447_v6  ;;  %v845_v8 = vand.u32 2147483647, %v447_v6  ;;  %v489_v9 = vpack.c.bf16 %v447_v6, %v445_v56 }
 0x135   : > { %v964_v11 = vsel %vm399_vm2, %v945_v7, 0.0  ;;  %vm791_vm10 = vcmp.lt.s32.totalorder %v772_v3, 300 }
 0x136   : > { %v1327_v13 = vpop.eup %1326  ;;  %v965_v14 = vadd.f32 %v964_v11, %v963_v10  ;;  %v864_v15 = vadd.f32 1.0, %v845_v8  ;;  %1266 = vmatmul.msk.bf16.gmra.mxu2 %vm399_vm2, %v489_v9  ;;  %v753_v10 = vadd.s32 56, %v1515_v40 }
 0x137   : > { %v885_v16 = vmul.f32 0.6931472, %v1327_v13 }
 0x138   : > { %1328 = vlog2.f32 %v864_v15  ;;  %v1598_v15 = vsel %vm791_vm10, 1.0, %v1388_v61 }
 0x139   : > { %v927_v18 = vmul.f32 %v1526_v55, %v885_v16  ;;  %v449_v20 = vpop.f32.mrf.mxu1 }
 0x13a   : > { %v450_v21 = vadd.f32 %v449_v20, %v1500_v23 }
 0x13b   : > { %v946_v22 = vmul.f32 %v1552_v17, %v927_v18  ;;  %v773_v18 = vadd.s32 %v1517_v41, %v753_v10 }
 0x13c   : > { %709 = vst.msk [vmem:[%s1506_s21 + $0x20] sm:$0xff] %vm399_vm2, %v450_v21  ;;  %v846_v24 = vand.u32 2147483647, %v450_v21 }
 0x13d   : > { %v966_v25 = vsel %vm399_vm2, %v946_v22, 0.0  ;;  %vm792_vm11 = vcmp.lt.s32.totalorder %v773_v18, 300 }
 0x13e   : > { %v1329_v27 = vpop.eup %1328  ;;  %v967_v28 = vadd.f32 %v966_v25, %v965_v14  ;;  %v865_v29 = vadd.f32 1.0, %v846_v24 }
 0x13f   : > { %v887_v30 = vmul.f32 0.6931472, %v1329_v27  ;;  %v1608_v27 = vsel %vm792_vm11, 1.0, %v1388_v61 }
 0x140   : > { %1330 = vlog2.f32 %v865_v29 }
 0x141   : > { %v928_v32 = vmul.f32 %v1526_v55, %v887_v30  ;;  %v451_v34 = vpop.f32.mrf.mxu1 }
 0x142   : > { %v452_v36 = vadd.f32 %v451_v34, %v1500_v23 }
 0x143   : > { %v947_v37 = vmul.f32 %v1563_v31, %v928_v32 }
 0x144   : > { %710 = vst.msk [vmem:[%s1506_s21 + $0x28] sm:$0xff] %vm399_vm2, %v452_v36  ;;  %v847_v38 = vand.u32 2147483647, %v452_v36  ;;  %v490_v39 = vpack.c.bf16 %v452_v36, %v450_v21 }
 0x145   : > { %v968_v42 = vsel %vm399_vm2, %v947_v37, 0.0 }
 0x146   : > { %v1331_v44 = vpop.eup %1330  ;;  %v969_v45 = vadd.f32 %v968_v42, %v967_v28  ;;  %v866_v46 = vadd.f32 1.0, %v847_v38  ;;  %1267 = vmatmul.msk.bf16.gmra.mxu2 %vm399_vm2, %v490_v39 }
 0x147   : > { %v889_v47 = vmul.f32 0.6931472, %v1331_v44 }
 0x148   : > { %1332 = vlog2.f32 %v866_v46 }
 0x149   : > { %v929_v49 = vmul.f32 %v1526_v55, %v889_v47  ;;  %v454_v51 = vpop.f32.mrf.mxu1 }
 0x14a   : > { %v455_v52 = vadd.f32 %v454_v51, %v1500_v23 }
 0x14b   : > { %v948_v53 = vmul.f32 %v1575_v48, %v929_v49 }
 0x14c   : > { %711 = vst.msk [vmem:[%s1506_s21 + $0x30] sm:$0xff] %vm399_vm2, %v455_v52  ;;  %v848_v54 = vand.u32 2147483647, %v455_v52 }
 0x14d   : > { %v970_v56 = vsel %vm399_vm2, %v948_v53, 0.0 }
 0x14e   : > { %v1333_v58 = vpop.eup %1332  ;;  %v971_v59 = vadd.f32 %v970_v56, %v969_v45  ;;  %v867_v60 = vadd.f32 1.0, %v848_v54 }
 0x14f   : > { %v891_v63 = vmul.f32 0.6931472, %v1333_v58  ;;  %v271_v58 = vld [vmem:[%s1923_s1 + $0x68] sm:$0xff] }
 0x150   : > { %1334 = vlog2.f32 %v867_v60 }
 0x151   : > { %v930_v2 = vmul.f32 %v1526_v55, %v891_v63  ;;  %v456_v4 = vpop.f32.mrf.mxu1 }
 0x152   : > { %v457_v5 = vadd.f32 %v456_v4, %v1500_v23 }
 0x153   : > { %v949_v6 = vmul.f32 %v1586_v0, %v930_v2 }
 0x154   : > { %712 = vst.msk [vmem:[%s1506_s21 + $0x38] sm:$0xff] %vm399_vm2, %v457_v5  ;;  %v849_v7 = vand.u32 2147483647, %v457_v5  ;;  %v491_v8 = vpack.c.bf16 %v457_v5, %v455_v52  ;;  %v754_v5 = vadd.s32 64, %v1515_v40 }
 0x155   : > { %v972_v9 = vsel %vm399_vm2, %v949_v6, 0.0 }
 0x156   : > { %v1335_v11 = vpop.eup %1334  ;;  %v973_v12 = vadd.f32 %v972_v9, %v971_v59  ;;  %v868_v13 = vadd.f32 1.0, %v849_v7  ;;  %1268 = vmatmul.msk.bf16.gmra.mxu2 %vm399_vm2, %v491_v8  ;;  %v272_v59 = vld [vmem:[%s1923_s1 + $0x70] sm:$0xff]  ;;  %v269_v7 = vld [vmem:[%s1923_s1 + $0x58] sm:$0xff]  ;;  %v270_v8 = vld [vmem:[%s1923_s1 + $0x60] sm:$0xff]  ;;  %v755_v9 = vadd.s32 72, %v1515_v40  ;;  %v774_v18 = vadd.s32 %v1517_v41, %v754_v5 }
 0x157   : > { %v893_v14 = vmul.f32 0.6931472, %v1335_v11  ;;  %v274_v63 = vpack.c.bf16 %v272_v59, %v271_v58  ;;  %v273_v11 = vpack.c.bf16 %v270_v8, %v269_v7  ;;  %v761_v8 = vadd.s32 120, %v1515_v40 }
 0x158   : > { %1336 = vlog2.f32 %v868_v13  ;;  %vm793_vm12 = vcmp.lt.s32.totalorder %v774_v18, 300 }
 0x159   : > { %v931_v16 = vmul.f32 %v1526_v55, %v893_v14  ;;  %v459_v19 = vpop.f32.mrf.mxu1  ;;  %653 = vmatpush.bf16.msra.mxu3 %v274_v63  ;;  %v760_v63 = vadd.s32 112, %v1515_v40 }
 0x15a   : > { %v460_v20 = vadd.f32 %v459_v19, %v1500_v23  ;;  %v756_v19 = vadd.s32 80, %v1515_v40 }
 0x15b   : > { %v950_v21 = vmul.f32 %v1598_v15, %v931_v16  ;;  %v780_v18 = vadd.s32 %v1517_v41, %v760_v63  ;;  %v764_v63 = vadd.s32 144, %v1515_v40 }
 0x15c   : > { %713 = vst.msk [vmem:[%s1506_s21 + $0x40] sm:$0xff] %vm399_vm2, %v460_v20  ;;  %v850_v50 = vand.u32 2147483647, %v460_v20 }
 0x15d   : > { %v974_v22 = vsel %vm399_vm2, %v950_v21, 0.0  ;;  %654 = vmatpush.bf16.msra.mxu3 %v273_v11  ;;  %v775_v21 = vadd.s32 %v1517_v41, %v755_v9  ;;  %vm799_vm3 = vcmp.lt.s32.totalorder %v780_v18, 300 }
 0x15e   : > { %v1337_v24 = vpop.eup %1336  ;;  %v975_v25 = vadd.f32 %v974_v22, %v973_v12  ;;  %v869_v54 = vadd.f32 1.0, %v850_v50  ;;  %v757_v22 = vadd.s32 88, %v1515_v40 }
 0x15f   : > { %v895_v26 = vmul.f32 0.6931472, %v1337_v24  ;;  %vm794_vm13 = vcmp.lt.s32.totalorder %v775_v21, 300 }
 0x160   : > { %1338 = vlog2.f32 %v869_v54 }
 0x161   : > { %v932_v28 = vmul.f32 %v1526_v55, %v895_v26  ;;  %v461_v29 = vpop.f32.mrf.mxu1 }
 0x162   : > { %v462_v30 = vadd.f32 %v461_v29, %v1500_v23 }
 0x163   : > { %v951_v32 = vmul.f32 %v1608_v27, %v932_v28 }
 0x164   : > { %714 = vst.msk [vmem:[%s1506_s21 + $0x48] sm:$0xff] %vm399_vm2, %v462_v30  ;;  %v492_v33 = vpack.c.bf16 %v462_v30, %v460_v20  ;;  %v851_v52 = vand.u32 2147483647, %v462_v30  ;;  %v776_v30 = vadd.s32 %v1517_v41, %v756_v19 }
 0x165   : > { %v976_v34 = vsel %vm399_vm2, %v951_v32, 0.0 }
 0x166   : > { %v1616_v36 = vadd.f32 %v976_v34, %v975_v25  ;;  %1269 = vmatmul.msk.bf16.gmra.mxu2 %vm399_vm2, %v492_v33  ;;  %v870_v57 = vadd.f32 1.0, %v851_v52  ;;  %v1339_v14 = vpop.eup %1338  ;;  %vm795_vm14 = vcmp.lt.s32.totalorder %v776_v30, 300  ;;  %v1671_v52 = vsel %vm794_vm13, 1.0, %v1388_v61 }
 0x167   : > { %v897_v25 = vmul.f32 0.6931472, %v1339_v14  ;;  %v1677_v58 = vsel %vm795_vm14, 1.0, %v1388_v61 }
 0x168   : > { %1340 = vlog2.f32 %v870_v57 }
 0x169   : > { %v464_v37 = vpop.f32.mrf.mxu1 }
 0x16a   : > { %v465_v38 = vadd.f32 %v464_v37, %v1500_v23 }
 0x16c   : > { %715 = vst.msk [vmem:[%s1506_s21 + $0x50] sm:$0xff] %vm399_vm2, %v465_v38  ;;  %v852_v56 = vand.u32 2147483647, %v465_v38 }
 0x16e   : > { %v871_v2 = vadd.f32 1.0, %v852_v56  ;;  %v1341_v24 = vpop.eup %1340 }
 0x16f   : > { %v899_v37 = vmul.f32 0.6931472, %v1341_v24 }
 0x170   : > { %1342 = vlog2.f32 %v871_v2 }
 0x171   : > { %v466_v39 = vpop.f32.mrf.mxu1 }
 0x172   : > { %v467_v42 = vadd.f32 %v466_v39, %v1500_v23  ;;  %v758_v39 = vadd.s32 96, %v1515_v40 }
 0x174   : > { %716 = vst.msk [vmem:[%s1506_s21 + $0x58] sm:$0xff] %vm399_vm2, %v467_v42  ;;  %v493_v43 = vpack.c.bf16 %v467_v42, %v465_v38  ;;  %v853_v60 = vand.u32 2147483647, %v467_v42  ;;  %v777_v38 = vadd.s32 %v1517_v41, %v757_v22  ;;  %v933_v42 = vmul.f32 %v1526_v55, %v897_v25 }
 0x175   : > { %v778_v54 = vadd.s32 %v1517_v41, %v758_v39 }
 0x176   : > { %1270 = vmatmul.msk.bf16.gmra.mxu2 %vm399_vm2, %v493_v43  ;;  %v872_v10 = vadd.f32 1.0, %v853_v60  ;;  %v1343_v34 = vpop.eup %1342  ;;  %vm796_vm15 = vcmp.lt.s32.totalorder %v777_v38, 300 }
 0x177   : > { %v1685_v7 = vsel %vm796_vm15, 1.0, %v1388_v61  ;;  %vm797_vm0 = vcmp.lt.s32.totalorder %v778_v54, 300 }
 0x178   : > { %1344 = vlog2.f32 %v872_v10  ;;  %v1696_v21 = vsel %vm797_vm0, 1.0, %v1388_v61 }
 0x179   : > { %v469_v44 = vpop.f32.mrf.mxu1 }
 0x17a   : > { %v470_v45 = vadd.f32 %v469_v44, %v1500_v23 }
 0x17c   : > { %717 = vst.msk [vmem:[%s1506_s21 + $0x60] sm:$0xff] %vm399_vm2, %v470_v45  ;;  %v854_v3 = vand.u32 2147483647, %v470_v45 }
 0x17e   : > { %v873_v16 = vadd.f32 1.0, %v854_v3 }
 0x180   : > { %1346 = vlog2.f32 %v873_v16  ;;  %v762_v16 = vadd.s32 128, %v1515_v40 }
 0x181   : > { %v471_v46 = vpop.f32.mrf.mxu1 }
 0x182   : > { %v472_v47 = vadd.f32 %v471_v46, %v1500_v23  ;;  %v1666_v46 = vsel %vm793_vm12, 1.0, %v1388_v61 }
 0x183   : > { %v952_v56 = vmul.f32 %v1666_v46, %v933_v42  ;;  %v268_v42 = vld [vmem:[%s1923_s1 + $0x50] sm:$0xff] }
 0x184   : > { %718 = vst.msk [vmem:[%s1506_s21 + $0x68] sm:$0xff] %vm399_vm2, %v472_v47  ;;  %v494_v49 = vpack.c.bf16 %v472_v47, %v470_v45  ;;  %v855_v12 = vand.u32 2147483647, %v472_v47  ;;  %v1345_v45 = vpop.eup %1344  ;;  %v759_v47 = vadd.s32 104, %v1515_v40 }
 0x185   : > { %v903_v57 = vmul.f32 0.6931472, %v1345_v45  ;;  %v978_v10 = vsel %vm399_vm2, %v952_v56, 0.0 }
 0x186   : > { %1271 = vmatmul.msk.bf16.gmra.mxu2 %vm399_vm2, %v494_v49  ;;  %v874_v26 = vadd.f32 1.0, %v855_v12  ;;  %v901_v49 = vmul.f32 0.6931472, %v1343_v34  ;;  %v779_v59 = vadd.s32 %v1517_v41, %v759_v47 }
 0x187   : > { %v936_v11 = vmul.f32 %v1526_v55, %v903_v57  ;;  %v1722_v57 = vperm.slane %v268_v42, 0 }
 0x188   : > { %1348 = vlog2.f32 %v874_v26  ;;  %v935_v3 = vmul.f32 %v1526_v55, %v901_v49  ;;  %vm798_vm1 = vcmp.lt.s32.totalorder %v779_v59, 300  ;;  %v1725_v59 = vsel %vm799_vm3, 1.0, %v1388_v61 }
 0x189   : > { %v474_v51 = vpop.f32.mrf.mxu1  ;;  %v1707_v34 = vsel %vm798_vm1, 1.0, %v1388_v61 }
 0x18a   : > { %v475_v53 = vadd.f32 %v474_v51, %v1500_v23  ;;  %v1347_v51 = vpop.eup %1346 }
 0x18c   : > { %719 = vst.msk [vmem:[%s1506_s21 + $0x70] sm:$0xff] %vm399_vm2, %v475_v53  ;;  %v856_v20 = vand.u32 2147483647, %v475_v53 }
 0x18e   : > { %v875_v32 = vadd.f32 1.0, %v856_v20  ;;  %v1349_v2 = vpop.eup %1348  ;;  %v954_v20 = vmul.f32 %v1677_v58, %v935_v3 }
 0x18f   : > { %v907_v14 = vmul.f32 0.6931472, %v1349_v2 }
 0x190   : > { %1350 = vlog2.f32 %v875_v32  ;;  %v979_v32 = vadd.f32 %v978_v10, %v1616_v36  ;;  %v982_v45 = vsel %vm399_vm2, %v954_v20, 0.0 }
 0x191   : > { %v476_v4 = vpop.f32.mrf.mxu1 }
 0x192   : > { %v477_v6 = vadd.f32 %v476_v4, %v1500_v23  ;;  %v905_v4 = vmul.f32 0.6931472, %v1347_v51 }
 0x194   : > { %720 = vst.msk [vmem:[%s1506_s21 + $0x78] sm:$0xff] %vm399_vm2, %v477_v6  ;;  %v495_v13 = vpack.c.bf16 %v477_v6, %v475_v53  ;;  %v857_v28 = vand.u32 2147483647, %v477_v6  ;;  %v934_v53 = vmul.f32 %v1526_v55, %v899_v37  ;;  %v937_v22 = vmul.f32 %v1526_v55, %v905_v4 }
 0x195   : > { %v938_v37 = vmul.f32 %v1526_v55, %v907_v14 }
 0x196   : > { %1272 = vmatmul.msk.bf16.gmra.mxu2 %vm399_vm2, %v495_v13  ;;  %v876_v43 = vadd.f32 1.0, %v857_v28  ;;  %v953_v6 = vmul.f32 %v1671_v52, %v934_v53  ;;  %v1351_v9 = vpop.eup %1350  ;;  %v763_v28 = vadd.s32 136, %v1515_v40  ;;  %v956_v47 = vmul.f32 %v1696_v21, %v937_v22 }
 0x197   : > { %v909_v26 = vmul.f32 0.6931472, %v1351_v9 }
 0x198   : > { %1352 = vlog2.f32 %v876_v43  ;;  %v980_v25 = vsel %vm399_vm2, %v953_v6, 0.0  ;;  %v783_v53 = vadd.s32 %v1517_v41, %v763_v28  ;;  %v986_v6 = vsel %vm399_vm2, %v956_v47, 0.0 }
 0x199   : > { %v479_v29 = vpop.f32.mrf.mxu1  ;;  %v981_v36 = vadd.f32 %v980_v25, %v979_v32 }
 0x19a   : > { %v480_v33 = vadd.f32 %v479_v29, %v1500_v23  ;;  %v781_v29 = vadd.s32 %v1517_v41, %v761_v8  ;;  %vm802_vm6 = vcmp.lt.s32.totalorder %v783_v53, 300 }
 0x19b   : > { %v983_v3 = vadd.f32 %v982_v45, %v981_v36  ;;  %v1746_v25 = vsel %vm802_vm6, 1.0, %v1388_v61 }
 0x19c   : > { %721 = vst.msk [vmem:[%s1506_s21 + $0x80] sm:$0xff] %vm399_vm2, %v480_v33  ;;  %v858_v44 = vand.u32 2147483647, %v480_v33  ;;  %vm800_vm4 = vcmp.lt.s32.totalorder %v781_v29, 300 }
 0x19e   : > { %v877_v50 = vadd.f32 1.0, %v858_v44  ;;  %v1353_v19 = vpop.eup %1352  ;;  %v782_v44 = vadd.s32 %v1517_v41, %v762_v16  ;;  %v784_v16 = vadd.s32 %v1517_v41, %v764_v63 }
 0x19f   : > { %v911_v38 = vmul.f32 0.6931472, %v1353_v19 }
 0x1a0   : > { %1354 = vlog2.f32 %v877_v50  ;;  %v939_v50 = vmul.f32 %v1526_v55, %v909_v26  ;;  %vm801_vm5 = vcmp.lt.s32.totalorder %v782_v44, 300  ;;  %vm803_vm7 = vcmp.lt.s32.totalorder %v784_v16, 300 }
 0x1a1   : > { %v481_v60 = vpop.f32.mrf.mxu1  ;;  %v1738_v40 = vsel %vm801_vm5, 1.0, %v1388_v61  ;;  %v1756_v36 = vsel %vm803_vm7, 1.0, %v1388_v61 }
 0x1a2   : > { %v482_v5 = vadd.f32 %v481_v60, %v1500_v23  ;;  %v957_v60 = vmul.f32 %v1707_v34, %v938_v37  ;;  %v958_v10 = vmul.f32 %v1725_v59, %v939_v50 }
 0x1a4   : > { %722 = vst.msk [vmem:[%s1506_s21 + $0x88] sm:$0xff] %vm399_vm2, %v482_v5  ;;  %v859_v12 = vand.u32 2147483647, %v482_v5  ;;  %v496_v13 = vpack.c.bf16 %v482_v5, %v480_v33  ;;  %v955_v33 = vmul.f32 %v1685_v7, %v936_v11  ;;  %v1731_v5 = vsel %vm800_vm4, 1.0, %v1388_v61 }
 0x1a5   : > { %v988_v20 = vsel %vm399_vm2, %v957_v60, 0.0  ;;  %v990_v29 = vsel %vm399_vm2, %v958_v10, 0.0 }
 0x1a6   : > { %v878_v24 = vadd.f32 1.0, %v859_v12  ;;  %1273 = vmatmul.msk.bf16.gmra.mxu2 %vm399_vm2, %v496_v13  ;;  %v1355_v30 = vpop.eup %1354  ;;  %v984_v54 = vsel %vm399_vm2, %v955_v33, 0.0 }
 0x1a7   : > { %v913_v51 = vmul.f32 0.6931472, %v1355_v30  ;;  %v985_v12 = vadd.f32 %v984_v54, %v983_v3 }
 0x1a8   : > { %1356 = vlog2.f32 %v878_v24 }
 0x1a9   : > { %v484_v39 = vpop.f32.mrf.mxu1  ;;  %v538_v43 = vpop.f32.mrf.mxu2  ;;  %v941_v9 = vmul.f32 %v1526_v55, %v913_v51  ;;  %v987_v26 = vadd.f32 %v986_v6, %v985_v12 }
 0x1aa   : > { %v485_v49 = vadd.f32 %v484_v39, %v1500_v23  ;;  %v940_v23 = vmul.f32 %v1526_v55, %v911_v38  ;;  %v539_v11 = vadd.f32 %v538_v43, %v1722_v57 }
 0x1ab   : > { %v960_v28 = vmul.f32 %v1738_v40, %v941_v9  ;;  %v989_v41 = vadd.f32 %v988_v20, %v987_v26 }
 0x1ac   : > { %723 = vst.msk [vmem:[%s1506_s21 + $0x90] sm:$0xff] %vm399_vm2, %v485_v49  ;;  %v860_v56 = vand.u32 2147483647, %v485_v49  ;;  %v959_v19 = vmul.f32 %v1731_v5, %v940_v23  ;;  %v497_v24 = vpack.c.bf16 %v485_v49, %v485_v49  ;;  %v587_v30 = vmax.f32 %v539_v11, 0.0 }
 0x1ad   : > { %v991_v42 = vadd.f32 %v990_v29, %v989_v41  ;;  %v994_v44 = vsel %vm399_vm2, %v960_v28, 0.0 }
 0x1ae   : > { %v1357_v2 = vpop.eup %1356  ;;  %v879_v4 = vadd.f32 1.0, %v860_v56  ;;  %v992_v37 = vsel %vm399_vm2, %v959_v19, 0.0 }
 0x1af   : > { %v915_v8 = vmul.f32 0.6931472, %v1357_v2  ;;  %v993_v45 = vadd.f32 %v992_v37, %v991_v42 }
 0x1b0   : > { %1358 = vlog2.f32 %v879_v4 }
 0x1b1   : > { %v540_v13 = vpop.f32.mrf.mxu2  ;;  %v486_v14 = vpop.f32.mrf.mxu1  ;;  %v942_v18 = vmul.f32 %v1526_v55, %v915_v8  ;;  %v995_v51 = vadd.f32 %v994_v44, %v993_v45 }
 0x1b2   : > { %v541_v22 = vadd.f32 %v540_v13, %v1722_v57 }
 0x1b3   : > { %v961_v33 = vmul.f32 %v1746_v25, %v942_v18 }
 0x1b4   : > { %v588_v32 = vmax.f32 %v541_v22, 0.0 }
 0x1b5   : > { %v996_v50 = vsel %vm399_vm2, %v961_v33, 0.0 }
 0x1b6   : > { %v1359_v38 = vpop.eup %1358  ;;  %v606_v39 = vpack.c.bf16 %v588_v32, %v587_v30  ;;  %1274 = vmatmul.msk.bf16.gmra.mxu2 %vm399_vm2, %v497_v24  ;;  %v997_v54 = vadd.f32 %v996_v50, %v995_v51 }
 0x1b7   : > { %v917_v43 = vmul.f32 0.6931472, %v1359_v38 }
 0x1b8   : > { %1275 = vmatmul.msk.bf16.vlgmr.msra.gmra.mxu3 %vm399_vm2, %v606_v39 }
 0x1b9   : > { %v543_v47 = vpop.f32.mrf.mxu2  ;;  %v943_v49 = vmul.f32 %v1526_v55, %v917_v43 }
 0x1ba   : > { %v544_v23 = vadd.f32 %v543_v47, %v1722_v57 }
 0x1bb   : > { %v962_v53 = vmul.f32 %v1756_v36, %v943_v49 }
 0x1bc   : > { %v589_v2 = vmax.f32 %v544_v23, 0.0 }
 0x1bd   : > { %v998_v56 = vsel %vm399_vm2, %v962_v53, 0.0 }
 0x1be   : > { %v999_v60 = vadd.f32 %v998_v56, %v997_v54 }
 0x1c0   : > { %1000 = vadd.xlane.f32.xlu0 %v999_v60 }
 0x1c1   : > { %v545_v63 = vpop.f32.mrf.mxu2 }
 0x1c2   : > { %v546_v61 = vadd.f32 %v545_v63, %v1722_v57 }
 0x1c4   : > { %v590_v3 = vmax.f32 %v546_v61, 0.0 }
 0x1c6   : > { %v607_v4 = vpack.c.bf16 %v590_v3, %v589_v2 }
 0x1c8   : > { %1276 = vmatmul.msk.bf16.gmra.mxu3 %vm399_vm2, %v607_v4 }
 0x1c9   : > { %v548_v55 = vpop.f32.mrf.mxu2 }
 0x1ca   : > { %v549_v6 = vadd.f32 %v548_v55, %v1722_v57 }
 0x1cc   : > { %v591_v10 = vmax.f32 %v549_v6, 0.0 }
 0x1d1   : > { %v550_v8 = vpop.f32.mrf.mxu2 }
 0x1d2   : > { %v551_v9 = vadd.f32 %v550_v8, %v1722_v57 }
 0x1d4   : > { %v592_v11 = vmax.f32 %v551_v9, 0.0 }
 0x1d6   : > { %v608_v12 = vpack.c.bf16 %v592_v11, %v591_v10 }
 0x1d8   : > { %1277 = vmatmul.msk.bf16.gmra.mxu3 %vm399_vm2, %v608_v12 }
 0x1d9   : > { %v553_v13 = vpop.f32.mrf.mxu2 }
 0x1da   : > { %v554_v14 = vadd.f32 %v553_v13, %v1722_v57  ;;  %v275_v13 = vld [vmem:[%s1923_s1 + $0x78] sm:$0xff] }
 0x1dc   : > { %v593_v19 = vmax.f32 %v554_v14, 0.0 }
 0x1e1   : > { %v555_v16 = vpop.f32.mrf.mxu2 }
 0x1e2   : > { %v556_v18 = vadd.f32 %v555_v16, %v1722_v57 }
 0x1e4   : > { %v594_v20 = vmax.f32 %v556_v18, 0.0 }
 0x1e6   : > { %v609_v22 = vpack.c.bf16 %v594_v20, %v593_v19  ;;  %v1789_v19 = vperm.slane %v275_v13, 0 }
 0x1e8   : > { %1278 = vmatmul.msk.bf16.gmra.mxu3 %vm399_vm2, %v609_v22 }
 0x1e9   : > { %v558_v24 = vpop.f32.mrf.mxu2 }
 0x1ea   : > { %v559_v26 = vadd.f32 %v558_v24, %v1722_v57 }
 0x1ec   : > { %v595_v30 = vmax.f32 %v559_v26, 0.0 }
 0x1f1   : > { %v560_v28 = vpop.f32.mrf.mxu2 }
 0x1f2   : > { %v561_v29 = vadd.f32 %v560_v28, %v1722_v57 }
 0x1f4   : > { %v596_v32 = vmax.f32 %v561_v29, 0.0 }
 0x1f6   : > { %v610_v41 = vpack.c.bf16 %v596_v32, %v595_v30 }
 0x1f8   : > { %1279 = vmatmul.msk.bf16.gmra.mxu3 %vm399_vm2, %v610_v41  ;;  %v1360_v41 = vld [vmem:[%s1434_s23] sm:$0xff] }
 0x1f9   : > { %v563_v33 = vpop.f32.mrf.mxu2 }
 0x1fa   : > { %v564_v37 = vadd.f32 %v563_v33, %v1722_v57 }
 0x1fc   : > { %v597_v42 = vmax.f32 %v564_v37, 0.0 }
 0x201   : > { %v565_v38 = vpop.f32.mrf.mxu2 }
 0x202   : > { %v566_v39 = vadd.f32 %v565_v38, %v1722_v57 }
 0x204   : > { %v598_v43 = vmax.f32 %v566_v39, 0.0 }
 0x206   : > { %v611_v44 = vpack.c.bf16 %v598_v43, %v597_v42 }
 0x208   : > { %1280 = vmatmul.msk.bf16.gmra.mxu3 %vm399_vm2, %v611_v44 }
 0x209   : > { %v568_v45 = vpop.f32.mrf.mxu2 }
 0x20a   : > { %v569_v47 = vadd.f32 %v568_v45, %v1722_v57 }
 0x20c   : > { %v599_v51 = vmax.f32 %v569_v47, 0.0 }
 0x211   : > { %v570_v49 = vpop.f32.mrf.mxu2 }
 0x212   : > { %v571_v50 = vadd.f32 %v570_v49, %v1722_v57 }
 0x214   : > { %v600_v53 = vmax.f32 %v571_v50, 0.0 }
 0x216   : > { %v612_v54 = vpack.c.bf16 %v600_v53, %v599_v51 }
 0x218   : > { %1281 = vmatmul.msk.bf16.gmra.mxu3 %vm399_vm2, %v612_v54 }
 0x219   : > { %v573_v56 = vpop.f32.mrf.mxu2 }
 0x21a   : > { %v574_v60 = vadd.f32 %v573_v56, %v1722_v57  ;;  %v1362_v56 = vld [vmem:[%s1434_s23 + $0x10] sm:$0xff] }
 0x21c   : > { %v601_v61 = vmax.f32 %v574_v60, 0.0 }
 0x221   : > { %v575_v23 = vpop.f32.mrf.mxu2 }
 0x222   : > { %v576_v63 = vadd.f32 %v575_v23, %v1722_v57 }
 0x224   : > { %v602_v2 = vmax.f32 %v576_v63, 0.0 }
 0x226   : > { %v613_v3 = vpack.c.bf16 %v602_v2, %v601_v61 }
 0x228   : > { %1282 = vmatmul.msk.bf16.gmra.mxu3 %vm399_vm2, %v613_v3 }
 0x229   : > { %v578_v4 = vpop.f32.mrf.mxu2 }
 0x22a   : > { %v579_v55 = vadd.f32 %v578_v4, %v1722_v57  ;;  %v1363_v4 = vld [vmem:[%s1434_s23 + $0x18] sm:$0xff] }
 0x22c   : > { %v603_v10 = vmax.f32 %v579_v55, 0.0 }
 0x231   : > { %v580_v6 = vpop.f32.mrf.mxu2 }
 0x232   : > { %v581_v8 = vadd.f32 %v580_v6, %v1722_v57 }
 0x233   : > { %v1001_v9 = vpop.xlane.xlu0 %1000 }
 0x234   : > { %v604_v11 = vmax.f32 %v581_v8, 0.0  ;;  %v1002_v12 = vrot.slane %v1001_v9, 4 }
 0x236   : > { %v614_v14 = vpack.c.bf16 %v604_v11, %v603_v10  ;;  %v1003_v16 = vadd.f32 %v1002_v12, %v1001_v9  ;;  %v1364_v12 = vld [vmem:[%s1434_s23 + $0x20] sm:$0xff] }
 0x238   : > { %v1004_v18 = vrot.slane %v1003_v16, 2  ;;  %1283 = vmatmul.msk.bf16.gmra.mxu3 %vm399_vm2, %v614_v14 }
 0x239   : > { %v583_v20 = vpop.f32.mrf.mxu2 }
 0x23a   : > { %v1005_v22 = vadd.f32 %v1004_v18, %v1003_v16  ;;  %v584_v26 = vadd.f32 %v583_v20, %v1722_v57  ;;  %v1361_v57 = vld [vmem:[%s1434_s23 + $0x8] sm:$0xff] }
 0x23b   : > { %v656_v24 = vpop.f32.mrf.mxu3 }
 0x23c   : > { %v657_v28 = vadd.f32 %v656_v24, %v1789_v19  ;;  %v1006_v29 = vrot.slane %v1005_v22, 1  ;;  %v605_v32 = vmax.f32 %v584_v26, 0.0  ;;  %v1365_v24 = vld [vmem:[%s1434_s23 + $0x28] sm:$0xff] }
 0x23e   : > { %725 = vst.msk [vmem:[%s1795_s12] sm:$0xff] %vm724_vm8, %v657_v28  ;;  %v1007_v30 = vadd.f32 %v1006_v29, %v1005_v22  ;;  %v1009_v33 = vsub.f32 %v657_v28, %v1360_v41  ;;  %v615_v39 = vpack.c.bf16 %v605_v32, %v605_v32 }
 0x240   : > { %1306 = vpush %v1007_v30  ;;  %v1028_v42 = vmul.f32 %v1535_v62, %v1009_v33 }
 0x241   : > { %v585_v37 = vpop.f32.mrf.mxu2 }
 0x242   : > { %v1047_v45 = vmul.f32 %v1028_v42, %v1009_v33  ;;  %v1366_v33 = vld [vmem:[%s1434_s23 + $0x30] sm:$0xff] }
 0x243   : > { %v658_v38 = vpop.f32.mrf.mxu3 }
 0x244   : > { %v659_v43 = vadd.f32 %v658_v38, %v1789_v19  ;;  %v1066_v51 = vsel %vm724_vm8, %v1047_v45, 0.0 }
 0x246   : > { %726 = vst.msk [vmem:[%s1795_s12 + $0x8] sm:$0xff] %vm724_vm8, %v659_v43  ;;  %v1010_v44 = vsub.f32 %v659_v43, %v1361_v57 }
 0x248   : > { %v1029_v47 = vmul.f32 %v1538_v1, %v1010_v44  ;;  %1284 = vmatmul.msk.bf16.gmra.mxu3 %vm399_vm2, %v615_v39 }
 0x24a   : > { %v1048_v49 = vmul.f32 %v1029_v47, %v1010_v44  ;;  %v1367_v44 = vld [vmem:[%s1434_s23 + $0x38] sm:$0xff] }
 0x24b   : > { %v661_v50 = vpop.f32.mrf.mxu3 }
 0x24c   : > { %v1067_v53 = vsel %vm724_vm8, %v1048_v49, 0.0  ;;  %v662_v62 = vadd.f32 %v661_v50, %v1789_v19 }
 0x24d   : > { %v1068_v54 = vadd.f32 %v1067_v53, %v1066_v51 }
 0x24e   : > { %727 = vst.msk [vmem:[%s1795_s12 + $0x10] sm:$0xff] %vm724_vm8, %v662_v62  ;;  %v1011_v60 = vsub.f32 %v662_v62, %v1362_v56 }
 0x250   : > { %v1030_v1 = vmul.f32 %v1552_v17, %v1011_v60 }
 0x252   : > { %v1049_v23 = vmul.f32 %v1030_v1, %v1011_v60 }
 0x253   : > { %v663_v63 = vpop.f32.mrf.mxu3 }
 0x254   : > { %v1069_v61 = vsel %vm724_vm8, %v1049_v23, 0.0  ;;  %v664_v2 = vadd.f32 %v663_v63, %v1789_v19 }
 0x255   : > { %v1070_v3 = vadd.f32 %v1069_v61, %v1068_v54 }
 0x256   : > { %728 = vst.msk [vmem:[%s1795_s12 + $0x18] sm:$0xff] %vm724_vm8, %v664_v2  ;;  %v1012_v55 = vsub.f32 %v664_v2, %v1363_v4 }
 0x258   : > { %v1031_v6 = vmul.f32 %v1563_v31, %v1012_v55 }
 0x25a   : > { %v1050_v8 = vmul.f32 %v1031_v6, %v1012_v55  ;;  %v1368_v55 = vld [vmem:[%s1434_s23 + $0x40] sm:$0xff] }
 0x25b   : > { %v666_v9 = vpop.f32.mrf.mxu3 }
 0x25c   : > { %v1071_v17 = vsel %vm724_vm8, %v1050_v8, 0.0  ;;  %v667_v10 = vadd.f32 %v666_v9, %v1789_v19  ;;  %v1369_v9 = vld [vmem:[%s1434_s23 + $0x48] sm:$0xff] }
 0x25d   : > { %v1072_v11 = vadd.f32 %v1071_v17, %v1070_v3 }
 0x25e   : > { %729 = vst.msk [vmem:[%s1795_s12 + $0x20] sm:$0xff] %vm724_vm8, %v667_v10  ;;  %v1013_v13 = vsub.f32 %v667_v10, %v1364_v12  ;;  %v1370_v12 = vld [vmem:[%s1434_s23 + $0x50] sm:$0xff] }
 0x260   : > { %v1032_v14 = vmul.f32 %v1575_v48, %v1013_v13 }
 0x262   : > { %v1051_v16 = vmul.f32 %v1032_v14, %v1013_v13 }
 0x263   : > { %v668_v18 = vpop.f32.mrf.mxu3 }
 0x264   : > { %v1073_v31 = vsel %vm724_vm8, %v1051_v16, 0.0  ;;  %v669_v20 = vadd.f32 %v668_v18, %v1789_v19  ;;  %v1371_v16 = vld [vmem:[%s1434_s23 + $0x58] sm:$0xff] }
 0x265   : > { %v1074_v22 = vadd.f32 %v1073_v31, %v1072_v11 }
 0x266   : > { %730 = vst.msk [vmem:[%s1795_s12 + $0x28] sm:$0xff] %vm724_vm8, %v669_v20  ;;  %v1014_v26 = vsub.f32 %v669_v20, %v1365_v24 }
 0x268   : > { %v1033_v28 = vmul.f32 %v1586_v0, %v1014_v26 }
 0x26a   : > { %v1052_v29 = vmul.f32 %v1033_v28, %v1014_v26 }
 0x26b   : > { %v671_v30 = vpop.f32.mrf.mxu3 }
 0x26c   : > { %v1075_v48 = vsel %vm724_vm8, %v1052_v29, 0.0  ;;  %v672_v32 = vadd.f32 %v671_v30, %v1789_v19  ;;  %v1373_v29 = vld [vmem:[%s1434_s23 + $0x68] sm:$0xff] }
 0x26d   : > { %v1076_v41 = vadd.f32 %v1075_v48, %v1074_v22  ;;  %v1372_v22 = vld [vmem:[%s1434_s23 + $0x60] sm:$0xff] }
 0x26e   : > { %731 = vst.msk [vmem:[%s1795_s12 + $0x30] sm:$0xff] %vm724_vm8, %v672_v32  ;;  %v1015_v37 = vsub.f32 %v672_v32, %v1366_v33  ;;  %v1374_v33 = vld [vmem:[%s1434_s23 + $0x70] sm:$0xff] }
 0x270   : > { %v1034_v38 = vmul.f32 %v1598_v15, %v1015_v37 }
 0x271   : > { %s1307_s20 = spop %1306 }
 0x272   : > { %v1053_v39 = vmul.f32 %v1034_v38, %v1015_v37 }
 0x273   : > { %v673_v42 = vpop.f32.mrf.mxu3 }
 0x274   : > { %v1077_v0 = vsel %vm724_vm8, %v1053_v39, 0.0  ;;  %v674_v43 = vadd.f32 %v673_v42, %v1789_v19 }
 0x275   : > { %v1078_v57 = vadd.f32 %v1077_v0, %v1076_v41 }
 0x276   : > { %732 = vst.msk [vmem:[%s1795_s12 + $0x38] sm:$0xff] %vm724_vm8, %v674_v43  ;;  %v1016_v45 = vsub.f32 %v674_v43, %v1367_v44 }
 0x278   : > { %v1035_v47 = vmul.f32 %v1608_v27, %v1016_v45 }
 0x27a   : > { %v1054_v49 = vmul.f32 %v1035_v47, %v1016_v45 }
 0x27b   : > { %v676_v50 = vpop.f32.mrf.mxu3 }
 0x27c   : > { %v1079_v15 = vsel %vm724_vm8, %v1054_v49, 0.0  ;;  %v677_v51 = vadd.f32 %v676_v50, %v1789_v19 }
 0x27d   : > { %v1080_v53 = vadd.f32 %v1079_v15, %v1078_v57 }
 0x27e   : > { %733 = vst.msk [vmem:[%s1795_s12 + $0x40] sm:$0xff] %vm724_vm8, %v677_v51  ;;  %v1017_v6 = vsub.f32 %v677_v51, %v1368_v55 }
 0x280   : > { %v1036_v11 = vmul.f32 %v1666_v46, %v1017_v6 }
 0x282   : > { %v1055_v31 = vmul.f32 %v1036_v11, %v1017_v6 }
 0x283   : > { %v678_v62 = vpop.f32.mrf.mxu3 }
 0x284   : > { %v679_v54 = vadd.f32 %v678_v62, %v1789_v19 }
 0x286   : > { %734 = vst.msk [vmem:[%s1795_s12 + $0x48] sm:$0xff] %vm724_vm8, %v679_v54  ;;  %v1018_v17 = vsub.f32 %v679_v54, %v1369_v9  ;;  %v1378_v9 = vld [vmem:[%s1434_s23 + $0x90] sm:$0xff] }
 0x288   : > { %v1037_v14 = vmul.f32 %v1671_v52, %v1018_v17  ;;  %v1081_v52 = vsel %vm724_vm8, %v1055_v31, 0.0 }
 0x289   : > { %v1082_v0 = vadd.f32 %v1081_v52, %v1080_v53 }
 0x28a   : > { %v1056_v28 = vmul.f32 %v1037_v14, %v1018_v17 }
 0x28b   : > { %v681_v56 = vpop.f32.mrf.mxu3 }
 0x28c   : > { %v682_v27 = vadd.f32 %v681_v56, %v1789_v19 }
 0x28e   : > { %735 = vst.msk [vmem:[%s1795_s12 + $0x50] sm:$0xff] %vm724_vm8, %v682_v27  ;;  %v1019_v13 = vsub.f32 %v682_v27, %v1370_v12 }
 0x290   : > { %v1038_v20 = vmul.f32 %v1677_v58, %v1019_v13  ;;  %v1083_v58 = vsel %vm724_vm8, %v1056_v28, 0.0 }
 0x291   : > { %v1084_v47 = vadd.f32 %v1083_v58, %v1082_v0 }
 0x292   : > { %v1057_v32 = vmul.f32 %v1038_v20, %v1019_v13 }
 0x293   : > { %v683_v60 = vpop.f32.mrf.mxu3 }
 0x294   : > { %v684_v1 = vadd.f32 %v683_v60, %v1789_v19  ;;  %v1085_v43 = vsel %vm724_vm8, %v1057_v32, 0.0 }
 0x295   : > { %v1086_v62 = vadd.f32 %v1085_v43, %v1084_v47 }
 0x296   : > { %736 = vst.msk [vmem:[%s1795_s12 + $0x58] sm:$0xff] %vm724_vm8, %v684_v1  ;;  %v1020_v18 = vsub.f32 %v684_v1, %v1371_v16 }
 0x298   : > { %v1039_v46 = vmul.f32 %v1685_v7, %v1020_v18  ;;  %v1375_v7 = vld [vmem:[%s1434_s23 + $0x78] sm:$0xff] }
 0x29a   : > { %v1058_v38 = vmul.f32 %v1039_v46, %v1020_v18 }
 0x29b   : > { %v686_v23 = vpop.f32.mrf.mxu3 }
 0x29c   : > { %v687_v63 = vadd.f32 %v686_v23, %v1789_v19  ;;  %v1087_v50 = vsel %vm724_vm8, %v1058_v38, 0.0 }
 0x29d   : > { %v1088_v60 = vadd.f32 %v1087_v50, %v1086_v62 }
 0x29e   : > { %737 = vst.msk [vmem:[%s1795_s12 + $0x60] sm:$0xff] %vm724_vm8, %v687_v63  ;;  %v1021_v24 = vsub.f32 %v687_v63, %v1372_v22 }
 0x2a0   : > { %v1040_v41 = vmul.f32 %v1696_v21, %v1021_v24  ;;  %v1376_v21 = vld [vmem:[%s1434_s23 + $0x80] sm:$0xff] }
 0x2a2   : > { %v1059_v57 = vmul.f32 %v1040_v41, %v1021_v24 }
 0x2a3   : > { %v688_v61 = vpop.f32.mrf.mxu3 }
 0x2a4   : > { %v689_v2 = vadd.f32 %v688_v61, %v1789_v19  ;;  %v1089_v53 = vsel %vm724_vm8, %v1059_v57, 0.0 }
 0x2a5   : > { %v1090_v63 = vadd.f32 %v1089_v53, %v1088_v60 }
 0x2a6   : > { %738 = vst.msk [vmem:[%s1795_s12 + $0x68] sm:$0xff] %vm724_vm8, %v689_v2  ;;  %v1022_v30 = vsub.f32 %v689_v2, %v1373_v29 }
 0x2a8   : > { %v1041_v39 = vmul.f32 %v1707_v34, %v1022_v30 }
 0x2aa   : > { %v1060_v15 = vmul.f32 %v1041_v39, %v1022_v30  ;;  %v1115_v30 = vstv %s1307_s20 }
 0x2ab   : > { %v691_v3 = vpop.f32.mrf.mxu3 }
 0x2ac   : > { %v692_v4 = vadd.f32 %v691_v3, %v1789_v19  ;;  %v1091_v1 = vsel %vm724_vm8, %v1060_v15, 0.0 }
 0x2ad   : > { %v1092_v3 = vadd.f32 %v1091_v1, %v1090_v63 }
 0x2ae   : > { %739 = vst.msk [vmem:[%s1795_s12 + $0x70] sm:$0xff] %vm724_vm8, %v692_v4  ;;  %v1023_v37 = vsub.f32 %v692_v4, %v1374_v33 }
 0x2b0   : > { %v1042_v44 = vmul.f32 %v1725_v59, %v1023_v37  ;;  %v1377_v59 = vld [vmem:[%s1434_s23 + $0x88] sm:$0xff] }
 0x2b2   : > { %v1061_v54 = vmul.f32 %v1042_v44, %v1023_v37 }
 0x2b3   : > { %v693_v8 = vpop.f32.mrf.mxu3 }
 0x2b4   : > { %v694_v10 = vadd.f32 %v693_v8, %v1789_v19  ;;  %v1093_v61 = vsel %vm724_vm8, %v1061_v54, 0.0 }
 0x2b5   : > { %v1094_v8 = vadd.f32 %v1093_v61, %v1092_v3 }
 0x2b6   : > { %740 = vst.msk [vmem:[%s1795_s12 + $0x78] sm:$0xff] %vm724_vm8, %v694_v10  ;;  %v1024_v42 = vsub.f32 %v694_v10, %v1375_v7 }
 0x2b8   : > { %v1043_v51 = vmul.f32 %v1731_v5, %v1024_v42 }
 0x2ba   : > { %v1062_v23 = vmul.f32 %v1043_v51, %v1024_v42 }
 0x2bb   : > { %v696_v26 = vpop.f32.mrf.mxu3 }
 0x2bc   : > { %v697_v48 = vadd.f32 %v696_v26, %v1789_v19 }
 0x2be   : > { %741 = vst.msk [vmem:[%s1795_s12 + $0x80] sm:$0xff] %vm724_vm8, %v697_v48  ;;  %v1025_v45 = vsub.f32 %v697_v48, %v1376_v21 }
 0x2c0   : > { %v1044_v56 = vmul.f32 %v1738_v40, %v1025_v45  ;;  %v1095_v40 = vsel %vm724_vm8, %v1062_v23, 0.0 }
 0x2c1   : > { %v1096_v11 = vadd.f32 %v1095_v40, %v1094_v8 }
 0x2c2   : > { %v1063_v2 = vmul.f32 %v1044_v56, %v1025_v45 }
 0x2c3   : > { %v698_v49 = vpop.f32.mrf.mxu3 }
 0x2c4   : > { %v699_v34 = vadd.f32 %v698_v49, %v1789_v19  ;;  %v1097_v10 = vsel %vm724_vm8, %v1063_v2, 0.0 }
 0x2c5   : > { %v1098_v13 = vadd.f32 %v1097_v10, %v1096_v11 }
 0x2c6   : > { %742 = vst.msk [vmem:[%s1795_s12 + $0x88] sm:$0xff] %vm724_vm8, %v699_v34  ;;  %v1026_v27 = vsub.f32 %v699_v34, %v1377_v59 }
 0x2c8   : > { %v1045_v5 = vmul.f32 %v1746_v25, %v1026_v27 }
 0x2ca   : > { %v1064_v55 = vmul.f32 %v1045_v5, %v1026_v27 }
 0x2cb   : > { %v701_v4 = vpop.f32.mrf.mxu3 }
 0x2cc   : > { %v702_v6 = vadd.f32 %v701_v4, %v1789_v19  ;;  %v1099_v12 = vsel %vm724_vm8, %v1064_v55, 0.0 }
 0x2cd   : > { %v1100_v18 = vadd.f32 %v1099_v12, %v1098_v13 }
 0x2ce   : > { %743 = vst.msk [vmem:[%s1795_s12 + $0x90] sm:$0xff] %vm724_vm8, %v702_v6  ;;  %v1027_v17 = vsub.f32 %v702_v6, %v1378_v9 }
 0x2d0   : > { %v1046_v25 = vmul.f32 %v1756_v36, %v1027_v17  ;;  %v1113_v36 = vand.u32 127, %v745_v35 }
 0x2d2   : > { %v1065_v14 = vmul.f32 %v1046_v25, %v1027_v17  ;;  %vm1114_vm2 = vcmp.eq.s32.totalorder %v1113_v36, 0  ;;  %vm1117_vm9 = vcmp.eq.s32.totalorder %v1113_v36, 1 }
 0x2d3   : > { %v703_v16 = vpop.f32.mrf.mxu3  ;;  %v1116_v52 = vsel %vm1114_vm2, %v1115_v30, 0.0 }
 0x2d4   : > { %v1101_v19 = vsel %vm724_vm8, %v1065_v14, 0.0 }
 0x2d5   : > { %v1102_v31 = vadd.f32 %v1101_v19, %v1100_v18 }
 0x2d7   : > { %1103 = vadd.xlane.f32.xlu0 %v1102_v31 }
 0x34a   : > { %v1104_v20 = vpop.xlane.xlu0 %1103 }
 0x34b   : > { %v1105_v22 = vrot.slane %v1104_v20, 4 }
 0x34d   : > { %v1106_v24 = vadd.f32 %v1105_v22, %v1104_v20 }
 0x34f   : > { %v1107_v26 = vrot.slane %v1106_v24, 2 }
 0x351   : > { %v1108_v28 = vadd.f32 %v1107_v26, %v1106_v24 }
 0x353   : > { %v1109_v46 = vrot.slane %v1108_v28, 1 }
 0x355   : > { %v1110_v29 = vadd.f32 %v1109_v46, %v1108_v28 }
 0x357   : > { %1308 = vpush %v1110_v29 }
 0x388   : > { %s1309_s23 = spop %1308 }
 0x389   : > { %v1118_v48 = vstv %s1309_s23 }
 0x38a   : > { %v1119_v32 = vsel %vm1117_vm9, %v1118_v48, 0.0 }
 0x38b   : > { %v1120_v41 = vadd.f32 %v1119_v32, %v1116_v52 }
 0x38d   : > { %1121 = vst [vmem:[%s222_s17] sm:$0x1] %v1120_v41 }
 0x38e PF: > { %s15_s15 = sadd.s32 1, %s1385_s15  }
 0x38f   : > { %p12_p5 = scmp.ge.s32.totalorder %s15_s15, 4  }
 0x391   :  { %14 = sbr.rel (!%p12_p5) target bundleno = 1 (0x1), region = 82 }

</bundles_post_ra>
